<compile_context>
chip_gen: v7x
topology: tpu7x:2x2x1
jax: 0.10.0
libtpu: 0.0.40
codegen_flags: <defaults>
</compile_context>

<pallas_src>
import numpy as np
import jax
import jax.numpy as jnp
from jax.experimental import pallas as pl
from jax.experimental.pallas import tpu as pltpu


def _fir_1d(fir_taps, factor):
    """1-D separable taps equivalent to make_kernel(taps) * factor**2."""
    k = np.asarray(fir_taps, dtype=np.float64)
    assert k.ndim == 1, "separable (1-D) FIR taps expected"
    # outer(k,k)/sum(outer) * f^2 == outer(k*f/sum(k), k*f/sum(k))
    return k * factor / k.sum()


def upsample(x, fir_taps=(1, 3, 3, 1), factor=2):
    """Pallas implementation of Upsample.forward (upfirdn2d, up=factor, down=1)."""
    up = int(factor)
    k1 = _fir_1d(fir_taps, up)           # (K,) separable taps (already * factor)
    K = k1.shape[0]
    kf = k1[::-1]                        # upfirdn2d is a true convolution -> flip
    p = K - up
    pad0 = (p + 1) // 2 + up - 1
    pad1 = p // 2

    N, C, H, W = x.shape
    NC = N * C
    Wo = up * W                          # output width
    Wp = Wo + K - 1                      # zero-stuffed + padded width (pad0+pad1=K-1)

    # ---- row (H) polyphase tap tables (trace-time constants) -----------------
    # out[up*i + ph] = sum_d w[ph,d] * z[i + d], z = W-passed rows, OOB rows = 0.
    phase_taps = []
    for ph in range(up):
        taps = []
        for b in range(K):
            if (ph + b - pad0) % up == 0:
                taps.append(((ph + b - pad0) // up, float(kf[b])))
        phase_taps.append(taps)
    all_d = [d for taps in phase_taps for d, _ in taps]
    halo_top = max(0, -min(all_d))
    halo_bot = max(0, max(all_d))
    Hh = H + halo_top + halo_bot

    # ---- column (W) taps grouped by equal weight (halves the multiplies) -----
    groups = {}
    for b in range(K):
        groups.setdefault(float(kf[b]), []).append(b)
    w_groups = sorted(groups.items())    # [(weight, [lane offsets...]), ...]

    # ---- glue: one fused XLA op — zero-stuff W, pad W by FIR pad, pad H by the
    # polyphase halo.  ~2x input bytes; no up^2-sized intermediate tensors. ----
    x2 = x.reshape(NC, H, W)
    xw = jnp.zeros((NC, H, Wo), x.dtype).at[:, :, ::up].set(x2)
    xg = jnp.pad(xw, ((0, 0), (halo_top, halo_bot), (pad0, pad1)))   # (NC, Hh, Wp)

    # ---- channel batching: biggest divisor of N*C that fits a VMEM budget ----
    itemsize = int(np.dtype(x.dtype).itemsize)
    per_ch = (
        2 * Hh * Wp * itemsize                       # double-buffered input block
        + 2 * H * up * Wo * itemsize                 # double-buffered output block
        + (2 * Hh * Wp + Hh * Wo + (up + 2) * H * Wo) * 4   # f32 temporaries
    )
    budget = 12 * 1024 * 1024
    bc = max(1, min(NC, budget // max(per_ch, 1)))
    while NC % bc:
        bc -= 1
    if bc == NC and NC >= 2 and NC % 2 == 0:
        bc //= 2                                     # keep >=2 grid steps (megacore)
    grid = (NC // bc,)

    def kernel(xg_ref, o_ref):
        # Hoisted cast (done once, not per tap).
        xf = xg_ref[...].astype(jnp.float32)                     # (bc, Hh, Wp)

        # W pass: dense K-tap FIR along lanes over the zero-stuffed columns.
        # Taps are baked constants; equal taps share one multiply.
        yw = None
        for wgt, offs in w_groups:
            s = xf[:, :, offs[0]:offs[0] + Wo]
            for b in offs[1:]:
                s = s + xf[:, :, b:b + Wo]
            t = s * wgt
            yw = t if yw is None else yw + t                     # (bc, Hh, Wo)

        # H pass: polyphase — phase ph produces output rows up*i + ph.
        cache = {}

        def term(d, wgt):
            key = (d, wgt)
            if key not in cache:
                r0 = d + halo_top
                cache[key] = yw[:, r0:r0 + H, :] * wgt
            return cache[key]

        for ph in range(up):
            taps = phase_taps[ph]
            slab = term(*taps[0])
            for d, wgt in taps[1:]:
                slab = slab + term(d, wgt)
            # Contiguous, lane-dense store; lane range [ph*Wo, (ph+1)*Wo) is
            # output row phase ph (interleaving done by the free reshape below).
            o_ref[:, :, ph * Wo:(ph + 1) * Wo] = slab.astype(o_ref.dtype)

    flops = 2 * (K + up) * NC * H * Wo
    bytes_accessed = int(xg.size) * itemsize + NC * H * up * Wo * itemsize

    out3 = pl.pallas_call(
        kernel,
        grid=grid,
        in_specs=[pl.BlockSpec((bc, Hh, Wp), lambda i: (i, 0, 0))],
        out_specs=pl.BlockSpec((bc, H, up * Wo), lambda i: (i, 0, 0)),
        out_shape=jax.ShapeDtypeStruct((NC, H, up * Wo), x.dtype),
        compiler_params=pltpu.CompilerParams(
            dimension_semantics=("parallel",),
            vmem_limit_bytes=32 * 1024 * 1024),
        cost_estimate=pl.CostEstimate(
            flops=flops, transcendentals=0, bytes_accessed=bytes_accessed),
    )(xg)

    # Free reshape (same memory order): (NC, H, up*Wo) -> (N, C, up*H, up*W),
    # row up*i + ph of the result is lane range [ph*Wo, (ph+1)*Wo) of row i.
    return out3.reshape(N, C, up * H, up * W)


def upsample_ref(x, fir_taps=(1, 3, 3, 1), factor=2):
    """Pure-JAX reference (lax conv with lhs dilation) for verification."""
    k = np.asarray(fir_taps, dtype=np.float32)
    if k.ndim == 1:
        k = k[None, :] * k[:, None]
    k = k / k.sum() * (factor ** 2)
    kh, kw = k.shape
    p = kh - factor
    pad0 = (p + 1) // 2 + factor - 1
    pad1 = p // 2
    N, C, H, W = x.shape
    wf = jnp.asarray(np.ascontiguousarray(k[::-1, ::-1]), dtype=x.dtype)
    wf = jnp.tile(wf[None, None], (C, 1, 1, 1))       # (C, 1, kh, kw) depthwise
    return jax.lax.conv_general_dilated(
        x, wf, window_strides=(1, 1),
        padding=((pad0, pad1 + factor - 1), (pad0, pad1 + factor - 1)),
        lhs_dilation=(factor, factor),
        dimension_numbers=("NCHW", "OIHW", "NCHW"),
        feature_group_count=C)


if __name__ == "__main__":
    key = jax.random.PRNGKey(0)
    x = jax.random.normal(key, (2, 4, 16, 16), dtype=jnp.float32)

    out = jax.block_until_ready(upsample(x))
    assert out.shape == (2, 4, 32, 32), out.shape

    ref = upsample_ref(x)
    err = float(jnp.max(jnp.abs(out - ref)))
    assert err < 1e-4, f"mismatch vs reference: {err}"

    print("KERNEL_OK")
</pallas_src>

<mosaic_0001>
module attributes {stable_mosaic.version = 11 : i64} {
  func.func @kernel(%arg0: i32, %arg1: memref<4x18x35xf32, #tpu.memory_space<vmem>>, %arg2: memref<4x16x64xf32, #tpu.memory_space<vmem>>) attributes {dimension_semantics = [#tpu.dimension_semantics<parallel>], iteration_bounds = array<i64: 2>, scalar_prefetch = 0 : i64, scratch_operands = 0 : i64, tpu.core_type = #tpu.core_type<tc>, window_params = [{transform_indices = @transform_0, window_bounds = array<i64: 4, 18, 35>}, {transform_indices = @transform_1, window_bounds = array<i64: 4, 16, 64>}]} {
    %c0 = arith.constant 0 : index
    %c0_0 = arith.constant 0 : index
    %c0_1 = arith.constant 0 : index
    %0 = vector.load %arg1[%c0, %c0_0, %c0_1] : memref<4x18x35xf32, #tpu.memory_space<vmem>>, vector<4x18x35xf32>
    %1 = vector.extract_strided_slice %0 {offsets = [0, 0, 0], sizes = [4, 18, 32], strides = [1, 1, 1]} : vector<4x18x35xf32> to vector<4x18x32xf32>
    %2 = vector.extract_strided_slice %0 {offsets = [0, 0, 3], sizes = [4, 18, 32], strides = [1, 1, 1]} : vector<4x18x35xf32> to vector<4x18x32xf32>
    %3 = arith.addf %1, %2 : vector<4x18x32xf32>
    %cst = arith.constant 2.500000e-01 : f32
    %4 = vector.broadcast %cst : f32 to vector<4x18x32xf32>
    %5 = arith.mulf %3, %4 : vector<4x18x32xf32>
    %6 = vector.extract_strided_slice %0 {offsets = [0, 0, 1], sizes = [4, 18, 32], strides = [1, 1, 1]} : vector<4x18x35xf32> to vector<4x18x32xf32>
    %7 = vector.extract_strided_slice %0 {offsets = [0, 0, 2], sizes = [4, 18, 32], strides = [1, 1, 1]} : vector<4x18x35xf32> to vector<4x18x32xf32>
    %8 = arith.addf %6, %7 : vector<4x18x32xf32>
    %cst_2 = arith.constant 7.500000e-01 : f32
    %9 = vector.broadcast %cst_2 : f32 to vector<4x18x32xf32>
    %10 = arith.mulf %8, %9 : vector<4x18x32xf32>
    %11 = arith.addf %5, %10 : vector<4x18x32xf32>
    %12 = vector.extract_strided_slice %11 {offsets = [0, 0, 0], sizes = [4, 16, 32], strides = [1, 1, 1]} : vector<4x18x32xf32> to vector<4x16x32xf32>
    %cst_3 = arith.constant 2.500000e-01 : f32
    %13 = vector.broadcast %cst_3 : f32 to vector<4x16x32xf32>
    %14 = arith.mulf %12, %13 : vector<4x16x32xf32>
    %15 = vector.extract_strided_slice %11 {offsets = [0, 1, 0], sizes = [4, 16, 32], strides = [1, 1, 1]} : vector<4x18x32xf32> to vector<4x16x32xf32>
    %cst_4 = arith.constant 7.500000e-01 : f32
    %16 = vector.broadcast %cst_4 : f32 to vector<4x16x32xf32>
    %17 = arith.mulf %15, %16 : vector<4x16x32xf32>
    %18 = arith.addf %14, %17 : vector<4x16x32xf32>
    %c0_5 = arith.constant 0 : index
    %c0_6 = arith.constant 0 : index
    %c0_7 = arith.constant 0 : index
    %19 = vector.load %arg2[%c0_5, %c0_6, %c0_7] : memref<4x16x64xf32, #tpu.memory_space<vmem>>, vector<4x16x32xf32>
    tpu.vector_store %arg2[%c0_5, %c0_6, %c0_7], %18 {strides = array<i32>} : memref<4x16x64xf32, #tpu.memory_space<vmem>>, vector<4x16x32xf32>,
    %20 = vector.extract_strided_slice %11 {offsets = [0, 2, 0], sizes = [4, 16, 32], strides = [1, 1, 1]} : vector<4x18x32xf32> to vector<4x16x32xf32>
    %cst_8 = arith.constant 2.500000e-01 : f32
    %21 = vector.broadcast %cst_8 : f32 to vector<4x16x32xf32>
    %22 = arith.mulf %20, %21 : vector<4x16x32xf32>
    %23 = arith.addf %17, %22 : vector<4x16x32xf32>
    %c0_9 = arith.constant 0 : index
    %c0_10 = arith.constant 0 : index
    %c32 = arith.constant 32 : index
    %24 = vector.load %arg2[%c0_9, %c0_10, %c32] : memref<4x16x64xf32, #tpu.memory_space<vmem>>, vector<4x16x32xf32>
    tpu.vector_store %arg2[%c0_9, %c0_10, %c32], %23 {strides = array<i32>} : memref<4x16x64xf32, #tpu.memory_space<vmem>>, vector<4x16x32xf32>,
    return
  }
  func.func @transform_0(%arg0: i32) -> (i32, i32, i32) {
    %c0_i32 = arith.constant 0 : i32
    %c0_i32_0 = arith.constant 0 : i32
    %c0_i32_1 = arith.constant 0 : i32
    return %arg0, %c0_i32, %c0_i32_0 : i32, i32, i32
  }
  func.func @transform_1(%arg0: i32) -> (i32, i32, i32) {
    %c0_i32 = arith.constant 0 : i32
    %c0_i32_0 = arith.constant 0 : i32
    %c0_i32_1 = arith.constant 0 : i32
    return %arg0, %c0_i32, %c0_i32_0 : i32, i32, i32
  }
}

</mosaic_0001>

<bundles_post_ra>
// kernel: tpu_custom_call.1
= control target key start
LH: loop header
LB: loop body
LE: loop exit
PB: predicated region body
PF: predicated region fallthrough
CT: control target
= control target key end

     0   :  { %6 = vsyncpa [#allocation3], 0  ;;  %s1035_s0 = inlined_call_operand.vmem [shape: f32[8,18,35], index: 0, kind: input, shape index: {}]   ;;  %s1036_s1 = inlined_call_operand.hbm [shape: f32[8,16,64], index: 1, kind: output, shape index: {}]  }
   0x1   :  { %8 = vsyncpa [#allocation3 + $0x1], 0  ;;  %s743_s6 = smov 0   ;;  %s745_s7 = smov 0  }
   0x2   :  { %s747_s8 = smov 0   ;;  %s749_s9 = smov 0  }
   0x3 LB: > { %s764_s10 = sadd.s32 4294967295, %s725_s9   ;;  %s603_s11 = sadd.s32 4294967294, %s725_s9   ;;  %s725_s9 = sphi %s749_s9, %s1042_s9   ;;  %s721_s8 = sphi %s747_s8, %s1041_s8   ;;  %s717_s7 = sphi %s745_s7, %s1040_s7   ;;  %s713_s6 = sphi %s743_s6, %s1039_s6  }
   0x4   : > { %s768_s12 = sadd.s32 1, %s725_s9   ;;  %s47_s13 = sadd.s32 1, %s721_s8 }
   0x5   : > { %s44_s14 = ssub.s32 %s725_s9, %s768_s12  ;;  %p57_p0 = scmp.ne.s32.totalorder %s721_s8, %s717_s7 }
   0x6   : > { %p45_p1 = scmp.eq.s32.totalorder %s44_s14, 0  ;;  %p58_p2 = scmp.eq.s32.totalorder %s764_s10, 1 }
   0x7   : > { %p63_p3 = scmp.ne.s32.totalorder %s717_s7, %s713_s6  ;;  %p64_p4 = scmp.eq.s32.totalorder %s603_s11, 1 }
   0x8   : > { %s779_s15 = scalar_select %p45_p1, %s721_s8, %s47_s13  }
   0x9   : > { %p781_p5 = por %p58_p2, %p57_p0  ;;  %p785_p6 = por %p64_p4, %p63_p3 }
   0xa   : > { %p606_p7 = scmp.ge.s32.totalorder %s725_s9, 1  ;;  %p92_p8 = scmp.lt.s32.totalorder %s725_s9, 3 }
   0xc   : > { %p93_p9 = pnand %p606_p7, %p92_p8 }
   0xd   : > { %s608_s18 = sshll.u32 (!%p93_p9), %s764_s10, 2  ;;  %s727_s23 = smov (!%p93_p9), 127   ;;  %vm357_vm0 = vcmask (!%p93_p9), 1046528   ;;  %vm394_vm1 = vcmask (!%p93_p9), 261120   ;;  %vm515_vm2 = vcmask (!%p93_p9), 516352   ;;  %vm513_vm3 = vcmask (!%p93_p9), 523520  }
   0xe   : > { %96 = sbr.rel (%p93_p9) target bundleno = 431 (0x1af), region = 24  ;;  %p114_p10 = scmp.lt.s32.totalorder (!%p93_p9), %s608_s18, 7  ;;  %vm511_vm4 = vcmask (!%p93_p9), 523521  }
   0xf   : > { %s728_s24 = smov (!%p93_p9), 125   ;;  %s110_s25 = sand.u32 (!%p93_p9), 1, %s717_s7  }
  0x10   : > { %s607_s26 = sshll.u32 (!%p93_p9), %s110_s25, 6  ;;  %s729_s27 = smov (!%p93_p9), 32  }
  0x11   : > { %s908_s28 = scalar_lea.vmem (!%p93_p9), [#allocation2], %s607_s26  ;;  %s617_s29 = sshll.u32 (!%p93_p9), %s764_s10, 10 }
  0x12   : > { %s541_s30 = sshll.u32 (!%p93_p9), %s908_s28, 4  ;;  %s984_s4 = scalar_lea.hbm (!%p93_p9), %s1036_s1, %s617_s29  ;;  %s986_s30 = int_to_ptr.vmem [resolvable:$true] %s541_s30 }
  0x13   : > { %s994_s5 = scalar_lea.sflag (!%p93_p9), [#allocation3], %s110_s25  ;;  %s663_s10 = scalar_lea.vmem (!%p93_p9), %s986_s30, 1024 }
  0x14   : > { %p664_p11 = scmp.ne.s32.totalorder (!%p93_p9), %s986_s30, %s663_s10  ;;  %s730_s11 = smov (!%p93_p9), [#allocation2]  }
  0x15   : > { %s1044_s18 = smov (!%p114_p10, %s608_s18), 7  ;;  %s667_s13 = sshll.u32 %s730_s11, 4  ;;  %s668_s13 = int_to_ptr.vmem [resolvable:$false] %s667_s13 }
  0x16   : > { %s618_s19 = smul.u32 24, %s1044_s18  ;;  %p665_p12 = pnand %p664_p11, %p781_p5 }
  0x17   : > { %s669_s14 = scalar_lea.vmem %s668_s13, 2048  ;;  %p670_p0 = scmp.lt.s32.totalorder %s986_s30, %s668_s13 }
  0x18   : > { %s118_s22 = scalar_lea.vmem %s1035_s0, %s618_s19  ;;  %p666_p13 = pneg %p665_p12 }
  0x19   : > { %v795_v0 = vld [vmem:[%s118_s22] sm:$0xff]  ;;  %v797_v1 = vld [vmem:[%s118_s22 + $0x10] sm:$0x3]  ;;  %v803_v2 = vld [vmem:[%s118_s22 + $0x8] sm:$0xff]  ;;  %p671_p1 = scmp.lt.s32.totalorder %s669_s14, %s663_s10 }
  0x1a   : > { %205 = vrot.lane.b32.xlu0 %v795_v0, %s727_s23  ;;  %209 = vrot.lane.b32.xlu1 %v797_v1, %s727_s23  ;;  %v805_v3 = vld [vmem:[%s118_s22 + $0x18] sm:$0xff]  ;;  %v811_v4 = vld [vmem:[%s118_s22 + $0x20] sm:$0xff] }
  0x1b   : > { %v813_v5 = vld [vmem:[%s118_s22 + $0x28] sm:$0x3]  ;;  %v819_v6 = vld [vmem:[%s118_s22 + $0x30] sm:$0xff]  ;;  %v821_v7 = vld [vmem:[%s118_s22 + $0x38] sm:$0xff]  ;;  %p672_p2 = por %p671_p1, %p670_p0 }
  0x1c   : > { %v827_v8 = vld [vmem:[%s118_s22 + $0x40] sm:$0x3]  ;;  %v829_v9 = vld [vmem:[%s118_s22 + $0x48] sm:$0xff]  ;;  %v835_v10 = vld [vmem:[%s118_s22 + $0x50] sm:$0xff] }
  0x1d   : > { %v837_v11 = vld [vmem:[%s118_s22 + $0x58] sm:$0x3]  ;;  %p673_p3 = pnand %p672_p2, %p666_p13 }
  0x1e   : > { %207 = vrot.lane.b32.xlu0 %v803_v2, %s727_s23  ;;  %211 = vrot.lane.b32.xlu1 %v805_v3, %s727_s23 }
  0x22   : > { %213 = vrot.lane.b32.xlu0 %v811_v4, %s727_s23  ;;  %215 = vrot.lane.b32.xlu1 %v813_v5, %s727_s23 }
  0x26   : > { %217 = vrot.lane.b32.xlu0 %v819_v6, %s727_s23  ;;  %219 = vrot.lane.b32.xlu1 %v821_v7, %s727_s23 }
  0x2a   : > { %221 = vrot.lane.b32.xlu0 %v827_v8, %s727_s23  ;;  %223 = vrot.lane.b32.xlu1 %v829_v9, %s727_s23 }
  0x2e   : > { %225 = vrot.lane.b32.xlu0 %v835_v10, %s727_s23  ;;  %227 = vrot.lane.b32.xlu1 %v837_v11, %s727_s23 }
  0x32   : > { %145 = vrot.lane.b32.xlu0 %v795_v0, %s728_s24  ;;  %147 = vrot.lane.b32.xlu1 %v803_v2, %s728_s24 }
  0x36   : > { %149 = vrot.lane.b32.xlu0 %v797_v1, %s728_s24  ;;  %151 = vrot.lane.b32.xlu1 %v805_v3, %s728_s24 }
  0x3a   : > { %153 = vrot.lane.b32.xlu0 %v811_v4, %s728_s24  ;;  %155 = vrot.lane.b32.xlu1 %v813_v5, %s728_s24 }
  0x3e   : > { %157 = vrot.lane.b32.xlu0 %v819_v6, %s728_s24  ;;  %159 = vrot.lane.b32.xlu1 %v821_v7, %s728_s24 }
  0x42   : > { %161 = vrot.lane.b32.xlu0 %v827_v8, %s728_s24  ;;  %163 = vrot.lane.b32.xlu1 %v829_v9, %s728_s24 }
  0x46   : > { %165 = vrot.lane.b32.xlu0 %v835_v10, %s728_s24  ;;  %167 = vrot.lane.b32.xlu1 %v837_v11, %s728_s24 }
  0x8c   : > { %v206_v12 = vpop.permute.xlu0 %205  ;;  %v210_v13 = vpop.permute.xlu1 %209 }
  0x8d   : > { %v241_v14 = vadd.f32 %v206_v12, %v795_v0  ;;  %v243_v15 = vadd.f32 %v210_v13, %v797_v1 }
  0x8f   : > { %v253_v16 = vmul.f32 0.75, %v241_v14  ;;  %v255_v19 = vmul.f32 0.75, %v243_v15 }
  0x90   : > { %v208_v17 = vpop.permute.xlu0 %207  ;;  %v212_v18 = vpop.permute.xlu1 %211 }
  0x91   : > { %v242_v20 = vadd.f32 %v208_v17, %v803_v2  ;;  %277 = vrot.lane.b32.xlu0 %v253_v16, %s727_s23  ;;  %v244_v21 = vadd.f32 %v212_v18, %v805_v3 }
  0x93   : > { %v254_v22 = vmul.f32 0.75, %v242_v20  ;;  %v256_v25 = vmul.f32 0.75, %v244_v21 }
  0x94   : > { %v214_v23 = vpop.permute.xlu0 %213  ;;  %v216_v24 = vpop.permute.xlu1 %215 }
  0x95   : > { %v245_v26 = vadd.f32 %v214_v23, %v811_v4  ;;  %281 = vrot.lane.b32.xlu0 %v255_v19, %s727_s23  ;;  %279 = vrot.lane.b32.xlu1 %v254_v22, %s727_s23  ;;  %v246_v27 = vadd.f32 %v216_v24, %v813_v5 }
  0x97   : > { %v257_v28 = vmul.f32 0.75, %v245_v26  ;;  %v258_v31 = vmul.f32 0.75, %v246_v27 }
  0x98   : > { %v218_v29 = vpop.permute.xlu0 %217  ;;  %v220_v30 = vpop.permute.xlu1 %219 }
  0x99   : > { %v247_v32 = vadd.f32 %v218_v29, %v819_v6  ;;  %283 = vrot.lane.b32.xlu1 %v256_v25, %s727_s23  ;;  %285 = vrot.lane.b32.xlu0 %v257_v28, %s727_s23  ;;  %v248_v33 = vadd.f32 %v220_v30, %v821_v7 }
  0x9b   : > { %v259_v34 = vmul.f32 0.75, %v247_v32  ;;  %v260_v37 = vmul.f32 0.75, %v248_v33 }
  0x9c   : > { %v222_v35 = vpop.permute.xlu0 %221  ;;  %v224_v36 = vpop.permute.xlu1 %223 }
  0x9d   : > { %v249_v38 = vadd.f32 %v222_v35, %v827_v8  ;;  %287 = vrot.lane.b32.xlu1 %v258_v31, %s727_s23  ;;  %289 = vrot.lane.b32.xlu0 %v259_v34, %s727_s23  ;;  %v250_v39 = vadd.f32 %v224_v36, %v829_v9 }
  0x9f   : > { %v261_v40 = vmul.f32 0.75, %v249_v38  ;;  %v262_v43 = vmul.f32 0.75, %v250_v39 }
  0xa0   : > { %v226_v41 = vpop.permute.xlu0 %225  ;;  %v228_v42 = vpop.permute.xlu1 %227 }
  0xa1   : > { %v251_v44 = vadd.f32 %v226_v41, %v835_v10  ;;  %291 = vrot.lane.b32.xlu1 %v260_v37, %s727_s23  ;;  %293 = vrot.lane.b32.xlu0 %v261_v40, %s727_s23  ;;  %v252_v45 = vadd.f32 %v228_v42, %v837_v11 }
  0xa3   : > { %v263_v46 = vmul.f32 0.75, %v251_v44  ;;  %v264_v47 = vmul.f32 0.75, %v252_v45 }
  0xa4   : > { %v146_v48 = vpop.permute.xlu0 %145  ;;  %v148_v49 = vpop.permute.xlu1 %147 }
  0xa5   : > { %295 = vrot.lane.b32.xlu1 %v262_v43, %s727_s23  ;;  %297 = vrot.lane.b32.xlu0 %v263_v46, %s727_s23  ;;  %v181_v59 = vadd.f32 %v146_v48, %v795_v0  ;;  %v182_v62 = vadd.f32 %v148_v49, %v803_v2 }
  0xa7   : > { %v193_v61 = vmul.f32 0.25, %v181_v59  ;;  %v194_v18 = vmul.f32 0.25, %v182_v62 }
  0xa8   : > { %v150_v50 = vpop.permute.xlu0 %149  ;;  %v152_v51 = vpop.permute.xlu1 %151 }
  0xa9   : > { %299 = vrot.lane.b32.xlu1 %v264_v47, %s727_s23  ;;  %v183_v63 = vadd.f32 %v150_v50, %v797_v1  ;;  %v184_v14 = vadd.f32 %v152_v51, %v805_v3 }
  0xab   : > { %v195_v19 = vmul.f32 0.25, %v183_v63  ;;  %v196_v3 = vmul.f32 0.25, %v184_v14 }
  0xac   : > { %v154_v52 = vpop.permute.xlu0 %153  ;;  %v156_v53 = vpop.permute.xlu1 %155 }
  0xad   : > { %v185_v15 = vadd.f32 %v154_v52, %v811_v4  ;;  %v186_v16 = vadd.f32 %v156_v53, %v813_v5 }
  0xaf   : > { %v197_v4 = vmul.f32 0.25, %v185_v15  ;;  %v198_v5 = vmul.f32 0.25, %v186_v16 }
  0xb0   : > { %v158_v54 = vpop.permute.xlu0 %157  ;;  %v160_v55 = vpop.permute.xlu1 %159 }
  0xb1   : > { %v187_v17 = vadd.f32 %v158_v54, %v819_v6  ;;  %v188_v0 = vadd.f32 %v160_v55, %v821_v7 }
  0xb3   : > { %v199_v6 = vmul.f32 0.25, %v187_v17  ;;  %v200_v27 = vmul.f32 0.25, %v188_v0 }
  0xb4   : > { %v162_v56 = vpop.permute.xlu0 %161  ;;  %v164_v57 = vpop.permute.xlu1 %163 }
  0xb5   : > { %v189_v20 = vadd.f32 %v162_v56, %v827_v8  ;;  %v190_v28 = vadd.f32 %v164_v57, %v829_v9 }
  0xb7   : > { %v201_v8 = vmul.f32 0.25, %v189_v20  ;;  %v202_v51 = vmul.f32 0.25, %v190_v28 }
  0xb8   : > { %v166_v58 = vpop.permute.xlu0 %165  ;;  %v168_v60 = vpop.permute.xlu1 %167 }
  0xb9   : > { %v191_v36 = vadd.f32 %v166_v58, %v835_v10  ;;  %v192_v40 = vadd.f32 %v168_v60, %v837_v11 }
  0xbb   : > { %v203_v52 = vmul.f32 0.25, %v191_v36  ;;  %v204_v55 = vmul.f32 0.25, %v192_v40 }
 0x103   : > { %v278_v12 = vpop.permute.xlu0 %277 }
 0x104   : > { %v313_v13 = vadd.f32 %v278_v12, %v193_v61 }
 0x106   : > { %v888_v2 = vmul.f32 0.75, %v313_v13  ;;  %v325_v37 = vmul.f32 0.25, %v313_v13 }
 0x107   : > { %v280_v1 = vpop.permute.xlu1 %279  ;;  %v282_v21 = vpop.permute.xlu0 %281 }
 0x108   : > { %v314_v22 = vadd.f32 %v280_v1, %v194_v18  ;;  %v315_v23 = vadd.f32 %v282_v21, %v195_v19  ;;  %v358_v29 = vrot.slane %v888_v2, 1  ;;  %v419_v59 = vrot.slane %v325_v37, 1 }
 0x10a   : > { %v326_v24 = vmul.f32 0.25, %v314_v22  ;;  %v334_v25 = vmul.f32 0.75, %v314_v22  ;;  %v335_v26 = vmul.f32 0.75, %v315_v23  ;;  %v403_v7 = vmul.f32 0.25, %v315_v23 }
 0x10b   : > { %v284_v30 = vpop.permute.xlu1 %283  ;;  %v286_v31 = vpop.permute.xlu0 %285 }
 0x10c   : > { %v359_v32 = vrot.slane %v334_v25, 1  ;;  %v420_v33 = vrot.slane %v326_v24, 1  ;;  %v361_v34 = vrot.slane %v335_v26, 1  ;;  %v422_v35 = vrot.slane %v403_v7, 1 }
 0x10d   : > { %v316_v38 = vadd.f32 %v284_v30, %v196_v3  ;;  %v317_v39 = vadd.f32 %v286_v31, %v197_v4 }
 0x10e   : > { %v360_v41 = vsel %vm357_vm0, %v358_v29, %v359_v32  ;;  %v362_v9 = vsel %vm357_vm0, %v359_v32, %v361_v34  ;;  %v453_v42 = vadd.f32 %v422_v35, %v335_v26  ;;  %v423_v11 = vsel %vm357_vm0, %v420_v33, %v422_v35 }
 0x10f   : > { %v386_v43 = vadd.f32 %v360_v41, %v325_v37  ;;  %v387_v44 = vadd.f32 %v362_v9, %v326_v24  ;;  %v327_v45 = vmul.f32 0.25, %v316_v38  ;;  %v899_v46 = vmul.f32 0.75, %v316_v38  ;;  %v288_v47 = vpop.permute.xlu1 %287  ;;  %v290_v48 = vpop.permute.xlu0 %289 }
 0x110   : > { %v901_v49 = vmul.f32 0.75, %v317_v39  ;;  %v318_v10 = vadd.f32 %v288_v47, %v198_v5  ;;  %v319_v50 = vadd.f32 %v290_v48, %v199_v6  ;;  %479 = vrot.lane.b32.xlu0 %v453_v42, %s729_s27  ;;  %v906_v54 = vmul.f32 0.25, %v317_v39 }
 0x111   : > { %v363_v53 = vrot.slane %v899_v46, 1  ;;  %396 = vst.msk [vmem:[%s908_s28 + $0x8] sm:$0xff] %vm394_vm1, %v387_v44  ;;  %395 = vst.msk [vmem:[%s908_s28] sm:$0xff] %vm394_vm1, %v386_v43  ;;  %v424_v60 = vrot.slane %v327_v45, 1  ;;  %v452_v12 = vadd.f32 %v423_v11, %v334_v25  ;;  %v421_v0 = vsel %vm357_vm0, %v419_v59, %v420_v33 }
 0x112   : > { %v364_v56 = vrot.slane %v901_v49, 1  ;;  %v338_v57 = vmul.f32 0.75, %v318_v10  ;;  %v915_v58 = vmul.f32 0.25, %v318_v10  ;;  %v917_v61 = vmul.f32 0.75, %v319_v50 }
 0x113   : > { %v292_v62 = vpop.permute.xlu1 %291  ;;  %v294_v63 = vpop.permute.xlu0 %293  ;;  %v425_v18 = vrot.slane %v906_v54, 1  ;;  %v329_v3 = vmul.f32 0.25, %v319_v50 }
 0x114   : > { %v365_v13 = vsel %vm357_vm0, %v363_v53, %v364_v56  ;;  %v366_v14 = vrot.slane %v338_v57, 1  ;;  %v427_v15 = vrot.slane %v915_v58, 1  ;;  %v320_v16 = vadd.f32 %v292_v62, %v200_v27 }
 0x115   : > { %v388_v17 = vadd.f32 %v365_v13, %v327_v45  ;;  %v321_v19 = vadd.f32 %v294_v63, %v201_v8  ;;  %v368_v25 = vrot.slane %v917_v61, 1  ;;  %v426_v30 = vsel %vm357_vm0, %v424_v60, %v425_v18 }
 0x116   : > { %v367_v20 = vsel %vm357_vm0, %v364_v56, %v366_v14  ;;  %v330_v1 = vmul.f32 0.25, %v320_v16  ;;  %v340_v21 = vmul.f32 0.75, %v320_v16  ;;  %v456_v22 = vadd.f32 %v427_v15, %v338_v57 }
 0x117   : > { %v389_v23 = vadd.f32 %v367_v20, %v906_v54  ;;  %v341_v4 = vmul.f32 0.75, %v321_v19  ;;  %v405_v5 = vmul.f32 0.25, %v321_v19  ;;  %v296_v6 = vpop.permute.xlu1 %295  ;;  %v298_v24 = vpop.permute.xlu0 %297  ;;  %397 = vst.msk [vmem:[%s908_s28 + $0x10] sm:$0xff] %vm394_vm1, %v388_v17  ;;  %v454_v44 = vadd.f32 %v426_v30, %v899_v46 }
 0x118   : > { %v369_v26 = vrot.slane %v340_v21, 1  ;;  %v322_v7 = vadd.f32 %v296_v6, %v202_v51  ;;  %v323_v27 = vadd.f32 %v298_v24, %v203_v52  ;;  %485 = vrot.lane.b32.xlu1 %v456_v22, %s729_s27  ;;  %v430_v8 = vrot.slane %v330_v1, 1 }
 0x119   : > { %v371_v28 = vrot.slane %v341_v4, 1  ;;  %v432_v29 = vrot.slane %v405_v5, 1  ;;  %398 = vst.msk [vmem:[%s908_s28 + $0x18] sm:$0xff] %vm394_vm1, %v389_v23  ;;  %v451_v45 = vadd.f32 %v421_v0, %v888_v2  ;;  %v428_v52 = vsel %vm357_vm0, %v425_v18, %v427_v15 }
 0x11a   : > { %v370_v31 = vsel %vm357_vm0, %v368_v25, %v369_v26  ;;  %v331_v32 = vmul.f32 0.25, %v322_v7  ;;  %v342_v33 = vmul.f32 0.75, %v322_v7  ;;  %v332_v34 = vmul.f32 0.25, %v323_v27 }
 0x11b   : > { %v390_v35 = vadd.f32 %v370_v31, %v329_v3  ;;  %v372_v36 = vsel %vm357_vm0, %v369_v26, %v371_v28  ;;  %v343_v37 = vmul.f32 0.75, %v323_v27  ;;  %v300_v38 = vpop.permute.xlu1 %299  ;;  %v459_v39 = vadd.f32 %v432_v29, %v341_v4 }
 0x11c   : > { %v391_v40 = vadd.f32 %v372_v36, %v330_v1  ;;  %v373_v41 = vrot.slane %v342_v33, 1  ;;  %477 = vrot.lane.b32.xlu1 %v452_v12, %s729_s27  ;;  %v324_v42 = vadd.f32 %v300_v38, %v204_v55  ;;  %v434_v43 = vrot.slane %v331_v32, 1 }
 0x11d   : > { %v374_v9 = vrot.slane %v343_v37, 1  ;;  %491 = vrot.lane.b32.xlu0 %v459_v39, %s729_s27  ;;  %399 = vst.msk [vmem:[%s908_s28 + $0x20] sm:$0xff] %vm394_vm1, %v390_v35  ;;  %v435_v48 = vrot.slane %v332_v34, 1  ;;  %v433_v50 = vsel %vm357_vm0, %v430_v8, %v432_v29  ;;  %v429_v46 = vrot.slane %v329_v3, 1 }
 0x11e   : > { %400 = vst.msk [vmem:[%s908_s28 + $0x28] sm:$0xff] %vm394_vm1, %v391_v40  ;;  %v344_v10 = vmul.f32 0.75, %v324_v42  ;;  %v406_v51 = vmul.f32 0.25, %v324_v42  ;;  %v458_v2 = vadd.f32 %v433_v50, %v340_v21  ;;  %v455_v55 = vadd.f32 %v428_v52, %v901_v49 }
 0x11f   : > { %v375_v47 = vsel %vm357_vm0, %v373_v41, %v374_v9  ;;  %v436_v56 = vsel %vm357_vm0, %v434_v43, %v435_v48  ;;  %v431_v59 = vsel %vm357_vm0, %v429_v46, %v430_v8 }
 0x120   : > { %v392_v11 = vadd.f32 %v375_v47, %v331_v32  ;;  %481 = vrot.lane.b32.xlu1 %v454_v44, %s729_s27  ;;  %v376_v53 = vrot.slane %v344_v10, 1  ;;  %v437_v58 = vrot.slane %v406_v51, 1  ;;  %v460_v60 = vadd.f32 %v436_v56, %v342_v33 }
 0x121   : > { %475 = vrot.lane.b32.xlu0 %v451_v45, %s729_s27  ;;  %v457_v62 = vadd.f32 %v431_v59, %v917_v61 }
 0x122   : > { %401 = vst.msk [vmem:[%s908_s28 + $0x30] sm:$0xff] %vm394_vm1, %v392_v11  ;;  %v377_v54 = vsel %vm357_vm0, %v374_v9, %v376_v53  ;;  %v438_v49 = vsel %vm357_vm0, %v435_v48, %v437_v58  ;;  %v462_v63 = vadd.f32 %v437_v58, %v344_v10 }
 0x123   : > { %v393_v57 = vadd.f32 %v377_v54, %v332_v34  ;;  %v461_v12 = vadd.f32 %v438_v49, %v343_v37 }
 0x124   : > { %489 = vrot.lane.b32.xlu1 %v458_v2, %s729_s27 }
 0x125   : > { %483 = vrot.lane.b32.xlu0 %v455_v55, %s729_s27  ;;  %402 = vst.msk [vmem:[%s908_s28 + $0x38] sm:$0xff] %vm394_vm1, %v393_v57 }
 0x128   : > { %493 = vrot.lane.b32.xlu1 %v460_v60, %s729_s27 }
 0x129   : > { %487 = vrot.lane.b32.xlu0 %v457_v62, %s729_s27 }
 0x12c   : > { %497 = vrot.lane.b32.xlu1 %v462_v63, %s729_s27 }
 0x12d   : > { %495 = vrot.lane.b32.xlu0 %v461_v12, %s729_s27 }
 0x182   : > { %v480_v13 = vpop.permute.xlu0 %479 }
 0x183   : > { %516 = vst.msk [vmem:[%s908_s28 + $0xf] sm:$0x1] %vm515_vm2, %v480_v13 }
 0x18a   : > { %v486_v61 = vpop.permute.xlu1 %485 }
 0x18b   : > { %519 = vst.msk [vmem:[%s908_s28 + $0x1f] sm:$0x1] %vm515_vm2, %v486_v61 }
 0x18e   : > { %v478_v14 = vpop.permute.xlu1 %477 }
 0x18f   : > { %514 = vst.msk [vmem:[%s908_s28 + $0x7] sm:$0xff] %vm513_vm3, %v478_v14  ;;  %v492_v15 = vpop.permute.xlu0 %491 }
 0x190   : > { %522 = vst.msk [vmem:[%s908_s28 + $0x2f] sm:$0x1] %vm515_vm2, %v492_v15 }
 0x192   : > { %v482_v16 = vpop.permute.xlu1 %481 }
 0x193   : > { %517 = vst.msk [vmem:[%s908_s28 + $0xf] sm:$0xfe] %vm511_vm4, %v482_v16  ;;  %v476_v17 = vpop.permute.xlu0 %475 }
 0x194   : > { %512 = vst.msk [vmem:[%s908_s28 - $0x1] sm:$0xfe] %vm511_vm4, %v476_v17 }
 0x196   : > { %v490_v18 = vpop.permute.xlu1 %489 }
 0x197   : > { %521 = vst.msk [vmem:[%s908_s28 + $0x27] sm:$0xff] %vm513_vm3, %v490_v18  ;;  %v484_v19 = vpop.permute.xlu0 %483 }
 0x198   : > { %518 = vst.msk [vmem:[%s908_s28 + $0x17] sm:$0xff] %vm513_vm3, %v484_v19 }
 0x19a   : > { %v494_v0 = vpop.permute.xlu1 %493 }
 0x19b   : > { %523 = vst.msk [vmem:[%s908_s28 + $0x2f] sm:$0xfe] %vm511_vm4, %v494_v0  ;;  %v488_v20 = vpop.permute.xlu0 %487 }
 0x19c   : > { %520 = vst.msk [vmem:[%s908_s28 + $0x1f] sm:$0xfe] %vm511_vm4, %v488_v20 }
 0x19e   : > { %v498_v1 = vpop.permute.xlu1 %497 }
 0x19f   : > { %525 = vst.msk [vmem:[%s908_s28 + $0x3f] sm:$0x1] %vm515_vm2, %v498_v1  ;;  %v496_v21 = vpop.permute.xlu0 %495 }
 0x1a0   : > { %524 = vst.msk [vmem:[%s908_s28 + $0x37] sm:$0xff] %vm513_vm3, %v496_v21 }
 0x1a1   : > { %676 = shalt.err (!%p673_p3)
}
 0x1a2   : > { %s677_s18 = scalar_lea.hbm %s984_s4, 1024  ;;  %s681_s21 = scalar_lea.hbm %s1036_s1, 2048 }
 0x1a3   : > { %p678_p4 = scmp.ne.s32.totalorder %s984_s4, %s677_s18  ;;  %p682_p9 = scmp.lt.u32.totalorder %s984_s4, %s1036_s1 }
 0x1a4   : > { %p683_p10 = scmp.lt.u32.totalorder %s681_s21, %s677_s18  ;;  %p685_p12 = scmp.lt.u32.totalorder %s677_s18, %s984_s4 }
 0x1a5   : > { %p679_p7 = pnand %p678_p4, %p781_p5 }
 0x1a6   : > { %p684_p11 = por %p683_p10, %p682_p9 }
 0x1a7   : > { %p680_p8 = pneg %p679_p7 }
 0x1a8   : > { %p686_p13 = por %p685_p12, %p684_p11 }
 0x1aa   : > { %p687_p0 = pnand %p686_p13, %p680_p8 }
 0x1ac   : > { %690 = shalt.err (!%p687_p0)
}
 0x1ad   : > { %s731_s24 = smov 128   ;;  %s732_s25 = smov 8  }
 0x1ae   : > { %619 = dma.vmem_to_hbm [thread:$0]  (%p781_p5), %s986_s30, 1024, %s984_s4, %s994_s5, %s731_s24, %s731_s24, %s732_s25  }
 0x1af PF: > { %p625_p1 = scmp.ge.s32.totalorder %s725_s9, 2  ;;  %s556_s26 = sand.u32 1, %s713_s6  }
 0x1b0   : > { %s557_s27 = scalar_lea.sflag [#allocation3], %s556_s26 }
 0x1b1   : > { %p622_p2 = pnand %p625_p1, %p785_p6 }
 0x1b3   : > { %708 = dma.done.wait (!%p622_p2), %s557_s27, 1024  }
 0x1b4   : > { %710 = vsyncadd (!%p622_p2), %s557_s27, 4294966272  ;;  %p11_p3 = scmp.ge.s32.totalorder %s768_s12, 4   ;;  %s1039_s6 = smov %s717_s7 }
 0x1b5   : > { %s1040_s7 = smov %s721_s8  ;;  %s1041_s8 = smov %s779_s15 }
 0x1b6   : > { %s1042_s9 = smov %s768_s12  ;;  %13 = sbr.rel (!%p11_p3) target bundleno = 3 (0x3), region = 59 }
 0x1bd   :  { %562 = vsyncpa [#allocation3], 1 }
 0x1be   :  { %564 = vsyncpa [#allocation3 + $0x1], 1 }

</bundles_post_ra>
